<compile_context>
chip_gen: v6e
topology: v6e:2x2x1
jax: 0.10.0
libtpu: 0.0.40
codegen_flags: <defaults>
</compile_context>

<pallas_src>
import numpy as np
import jax
import jax.numpy as jnp
from jax.experimental import pallas as pl
from jax.experimental.pallas import tpu as pltpu


def _round_up(x: int, m: int) -> int:
    return ((x + m - 1) // m) * m


def _chip_info():
    """(multi_tensorcore, per-step HBM byte target) — generation aware, best effort."""
    kind = ""
    try:
        kind = jax.devices()[0].device_kind.lower()
    except Exception:
        pass
    multi_core = any(tag in kind for tag in ("v7", "v4", "v5p"))
    # v7x drains ~1 MiB in ~0.3 us (== per-step overhead), so target bigger steps there.
    step_bytes = (4 << 20) if "v7" in kind else (2 << 20)
    return multi_core, step_bytes


def _choose_tiles(N: int, D: int, itemsize: int, tile_nodes: int):
    multi_core, step_bytes = _chip_info()
    # Feature split only helps on multi-TC chips (megacore 'parallel' axis) and only
    # when each half still keeps >= 512 B contiguous per row DMA chunk.
    split_d = multi_core and (D % 256 == 0) and (D // 2) * itemsize >= 512
    TD = D // 2 if split_d else D
    num_d = 2 if split_d else 1
    # Node tile: let the per-step byte budget bind, clamped to the data size.
    tn_budget = max(128, (step_bytes // max(1, TD * itemsize)) // 128 * 128)
    TN = min(int(tile_nodes), tn_budget, _round_up(N, 128))
    TN = max(128, (TN // 128) * 128)
    return TD, num_d, TN


# ----------------------------------------------------------------------------
# sum readout kernel (also used for mean; counts/divide live outside the kernel)
# ----------------------------------------------------------------------------
def _make_sum_kernel(B, N, TN, ragged):
    def kernel(seg_ref, h_ref, out_ref, acc_ref):
        t = pl.program_id(1)
        nt = pl.num_programs(1)

        @pl.when(t == 0)
        def _init():
            acc_ref[...] = jnp.zeros_like(acc_ref)

        h = h_ref[...]                                      # (TN, TD), native dtype
        if ragged:
            # The last tile extends past N: OOB block contents are undefined (may be
            # NaN/Inf), so zero them explicitly before the one-hot matmul.
            row = jax.lax.broadcasted_iota(jnp.int32, (TN, 1), 0) + t * TN
            h = jnp.where(row < N, h, jnp.array(0, h.dtype))

        seg = seg_ref[...]                                  # (1, TN) lane-dense
        gid = jax.lax.broadcasted_iota(jnp.int32, (B, TN), 0)
        one_hot = (gid == seg).astype(h.dtype)              # padded rows (seg==B) -> 0
        # transpose-free MXU matmul: (B, TN) @ (TN, TD) -> (B, TD), f32 accumulate
        acc_ref[...] += jnp.dot(one_hot, h, preferred_element_type=jnp.float32)

        @pl.when(t == nt - 1)
        def _finalize():
            out_ref[...] = acc_ref[...].astype(out_ref.dtype)

    return kernel


# ----------------------------------------------------------------------------
# max readout kernel: loop only over graphs present in the tile (seg_ids sorted)
# ----------------------------------------------------------------------------
def _make_max_kernel(B, TN):
    def kernel(glo_ref, ghi_ref, seg_ref, h_ref, out_ref, acc_ref):
        t = pl.program_id(1)
        nt = pl.num_programs(1)

        @pl.when(t == 0)
        def _init():
            acc_ref[...] = jnp.full_like(acc_ref, -jnp.inf)

        h = h_ref[...]                                      # (TN, TD)
        seg = seg_ref[...]                                  # (TN, 1) sublane layout
        g_lo = glo_ref[t]                                   # first graph in this tile
        g_hi = ghi_ref[t]                                   # last graph in this tile

        def body(b, carry):
            mask = seg == b                                 # (TN, 1)
            # Padded / ragged OOB rows have seg == B -> mask False -> -inf, so any
            # garbage (even NaN) in the partial last tile is excluded.
            m = jnp.max(jnp.where(mask, h, -jnp.inf), axis=0, keepdims=True)  # (1, TD)
            cur = acc_ref[pl.ds(b, 1), :]
            acc_ref[pl.ds(b, 1), :] = jnp.maximum(cur, m.astype(jnp.float32))
            return carry

        jax.lax.fori_loop(g_lo, g_hi + 1, body, 0)

        @pl.when(t == nt - 1)
        def _finalize():
            out_ref[...] = acc_ref[...].astype(out_ref.dtype)

    return kernel


# ----------------------------------------------------------------------------
# sum / max / mean readout
# ----------------------------------------------------------------------------
def segment_readout(h: jax.Array, seg_ids: jax.Array, num_graphs: int,
                    readout: str, *, tile_nodes: int = 8192) -> jax.Array:
    """Pallas equivalent of dgl.{sum,max,mean}_nodes on a batched graph."""
    N, D = h.shape
    B = int(num_graphs)
    itemsize = jnp.dtype(h.dtype).itemsize

    if readout == "mean":
        # Per-graph counts once, outside the kernel; divide after the sum kernel.
        # NOTE: empty graph => 0/0 = NaN (matches segment_sum / segment_sum reference).
        sums = segment_readout(h, seg_ids, B, "sum", tile_nodes=tile_nodes)
        counts = jnp.bincount(seg_ids.astype(jnp.int32), length=B).astype(jnp.float32)
        return (sums.astype(jnp.float32) / counts[:, None]).astype(h.dtype)

    TD, num_d, TN = _choose_tiles(N, D, itemsize, tile_nodes)
    num_tiles = (N + TN - 1) // TN
    ragged = (N % TN) != 0
    N_pad = num_tiles * TN

    seg = seg_ids.astype(jnp.int32)
    # Only seg is padded (tiny); h stays un-padded, the ragged tile is masked in-kernel.
    seg_p = jnp.pad(seg, (0, N_pad - N), constant_values=B) if N_pad != N else seg

    compiler_params = pltpu.CompilerParams(
        dimension_semantics=("parallel", "arbitrary"),   # feature tiles, node reduction
        vmem_limit_bytes=32 * 1024 * 1024,
    )

    if readout == "sum":
        # TODO(synk): for num_graphs beyond a few hundred the (B, TN) one-hot matmul
        # becomes compute-bound; switch to a sorted-segment, scalar-prefetched-offset
        # formulation in that regime.
        return pl.pallas_call(
            _make_sum_kernel(B, N, TN, ragged),
            out_shape=jax.ShapeDtypeStruct((B, D), h.dtype),
            grid_spec=pltpu.PrefetchScalarGridSpec(
                num_scalar_prefetch=0,
                grid=(num_d, num_tiles),
                in_specs=[
                    pl.BlockSpec((1, TN), lambda d, t: (0, t)),    # lane-dense seg ids
                    pl.BlockSpec((TN, TD), lambda d, t: (t, d)),   # node-feature tile
                ],
                out_specs=pl.BlockSpec((B, TD), lambda d, t: (0, d)),
                scratch_shapes=[pltpu.VMEM((B, TD), jnp.float32)],
            ),
            compiler_params=compiler_params,
        )(seg_p.reshape(1, N_pad), h)

    if readout == "max":
        # Per-tile graph range (seg_ids sorted): scalar-prefetched into SMEM so the
        # in-kernel loop only touches graphs actually present in the tile.
        starts = np.arange(num_tiles, dtype=np.int32) * TN
        ends = np.minimum(starts + TN - 1, N - 1)
        g_lo = seg[starts]
        g_hi = seg[ends]
        return pl.pallas_call(
            _make_max_kernel(B, TN),
            out_shape=jax.ShapeDtypeStruct((B, D), h.dtype),
            grid_spec=pltpu.PrefetchScalarGridSpec(
                num_scalar_prefetch=2,
                grid=(num_d, num_tiles),
                in_specs=[
                    pl.BlockSpec((TN, 1), lambda d, t, glo, ghi: (t, 0)),  # sublane seg
                    pl.BlockSpec((TN, TD), lambda d, t, glo, ghi: (t, d)),
                ],
                out_specs=pl.BlockSpec((B, TD), lambda d, t, glo, ghi: (0, d)),
                scratch_shapes=[pltpu.VMEM((B, TD), jnp.float32)],
            ),
            compiler_params=compiler_params,
        )(g_lo, g_hi, seg_p.reshape(N_pad, 1), h)

    raise NotImplementedError(readout)


# ----------------------------------------------------------------------------
# 'terminal' readout: gather rows whose out-degree == 0
# ----------------------------------------------------------------------------
def terminal_readout(h: jax.Array, out_degrees: jax.Array, *,
                     rows_per_step: int = 64) -> jax.Array:
    """Pallas equivalent of th.index_select(h, 0, where(out_degrees == 0))."""
    N, D = h.shape
    mask = out_degrees == 0
    # Compacted terminal-index list is computed on device; only the scalar count is
    # synced to host (the output length is dynamic, exactly as in the PyTorch module).
    # TODO(synk): callers that can accept a padded [max_T, D] output could drop even
    # this single-scalar sync.
    term_all = jnp.nonzero(mask, size=N, fill_value=0)[0].astype(jnp.int32)
    T = int(jax.device_get(jnp.sum(mask)))
    if T == 0:
        return jnp.zeros((0, D), dtype=h.dtype)

    R = max(8, min(int(rows_per_step), _round_up(T, 8)))
    T_pad = _round_up(T, R)
    if T_pad <= N:
        term_idx = term_all[:T_pad]
    else:
        term_idx = jnp.pad(term_all, (0, T_pad - N))   # pad with row 0 (valid, sliced off)

    def gather_kernel(idx_ref, h_hbm, out_ref, sems):
        i = pl.program_id(0)
        # DMA R rows straight from HBM into the pipelined output block (no staging
        # buffer), keeping all R row copies in flight before waiting on any of them.
        copies = []
        for r in range(R):
            src = idx_ref[i * R + r]
            cp = pltpu.make_async_copy(h_hbm.at[pl.ds(src, 1)],
                                       out_ref.at[pl.ds(r, 1)], sems.at[r])
            cp.start()
            copies.append(cp)
        for cp in copies:
            cp.wait()

    out = pl.pallas_call(
        gather_kernel,
        out_shape=jax.ShapeDtypeStruct((T_pad, D), h.dtype),
        grid_spec=pltpu.PrefetchScalarGridSpec(
            num_scalar_prefetch=1,                       # terminal row indices -> SMEM
            grid=(T_pad // R,),
            in_specs=[pl.BlockSpec(memory_space=pl.ANY)],      # h stays in HBM
            out_specs=pl.BlockSpec((R, D), lambda i, idx: (i, 0)),
            scratch_shapes=[pltpu.SemaphoreType.DMA((R,))],
        ),
        compiler_params=pltpu.CompilerParams(
            dimension_semantics=("parallel",),
        ),
    )(term_idx, h)
    return out[:T] if T_pad != T else out


# ----------------------------------------------------------------------------
# DynamicPooling wrapper
# ----------------------------------------------------------------------------
class DynamicPooling:
    def __init__(self, readout: str):
        self.readout = readout

    def __call__(self, h, seg_ids, num_graphs, out_degrees):
        if self.readout in ("sum", "max", "mean"):
            return segment_readout(h, seg_ids, num_graphs, self.readout)
        elif self.readout == "terminal":
            return terminal_readout(h, out_degrees)
        else:
            raise NotImplementedError


if __name__ == "__main__":
    key = jax.random.PRNGKey(0)
    k_h, k_deg, k_h2, k_deg2 = jax.random.split(key, 4)

    # ---- small batched graph: B=4 graphs, 256 nodes, D=256 features ----------------
    B = 4
    graph_sizes = [100, 28, 64, 64]
    N = sum(graph_sizes)
    D = 256

    h = jax.random.normal(k_h, (N, D), dtype=jnp.float32)
    seg_ids = jnp.asarray(np.repeat(np.arange(B, dtype=np.int32), graph_sizes))
    out_degrees = jax.random.randint(k_deg, (N,), 0, 3, dtype=jnp.int32)

    ones = jnp.ones((N, 1), jnp.float32)
    term_idx_ref = np.where(np.asarray(jax.device_get(out_degrees)) == 0)[0]
    ref = {
        "sum": jax.ops.segment_sum(h, seg_ids, num_segments=B),
        "max": jax.ops.segment_max(h, seg_ids, num_segments=B),
        "mean": jax.ops.segment_sum(h, seg_ids, num_segments=B)
        / jax.ops.segment_sum(ones, seg_ids, num_segments=B),
        "terminal": h[term_idx_ref],
    }
    for readout in ("sum", "max", "mean", "terminal"):
        out = jax.block_until_ready(DynamicPooling(readout)(h, seg_ids, B, out_degrees))
        np.testing.assert_allclose(np.asarray(out), np.asarray(ref[readout]),
                                   rtol=1e-5, atol=1e-5)

    # ---- ragged / multi-tile stress case: forces small tiles so the masked last
    #      tile and the multi-graph-per-tile max loop are exercised --------------------
    B2 = 5
    graph_sizes2 = [301, 57, 402, 140, 100]      # N2 = 1000 (not a multiple of 128)
    N2 = sum(graph_sizes2)
    D2 = 128
    h2 = jax.random.normal(k_h2, (N2, D2), dtype=jnp.float32)
    seg2 = jnp.asarray(np.repeat(np.arange(B2, dtype=np.int32), graph_sizes2))
    deg2 = jax.random.randint(k_deg2, (N2,), 0, 3, dtype=jnp.int32)
    ones2 = jnp.ones((N2, 1), jnp.float32)
    term2 = np.where(np.asarray(jax.device_get(deg2)) == 0)[0]
    ref2 = {
        "sum": jax.ops.segment_sum(h2, seg2, num_segments=B2),
        "max": jax.ops.segment_max(h2, seg2, num_segments=B2),
        "mean": jax.ops.segment_sum(h2, seg2, num_segments=B2)
        / jax.ops.segment_sum(ones2, seg2, num_segments=B2),
    }
    for readout in ("sum", "max", "mean"):
        out = jax.block_until_ready(
            segment_readout(h2, seg2, B2, readout, tile_nodes=256))
        np.testing.assert_allclose(np.asarray(out), np.asarray(ref2[readout]),
                                   rtol=1e-5, atol=1e-5)
    out_t = jax.block_until_ready(terminal_readout(h2, deg2, rows_per_step=16))
    np.testing.assert_allclose(np.asarray(out_t), np.asarray(h2[term2]),
                               rtol=1e-5, atol=1e-5)

    print("KERNEL_OK")
</pallas_src>

<mosaic_0001>
module attributes {stable_mosaic.version = 11 : i64} {
  func.func @kernel(%arg0: i32, %arg1: i32, %arg2: memref<1x256xi32, #tpu.memory_space<vmem>>, %arg3: memref<256x256xf32, #tpu.memory_space<vmem>>, %arg4: memref<4x256xf32, #tpu.memory_space<vmem>>, %arg5: memref<4x256xf32, #tpu.memory_space<vmem>>) attributes {dimension_semantics = [#tpu.dimension_semantics<parallel>, #tpu.dimension_semantics<arbitrary>], iteration_bounds = array<i64: 1, 1>, scalar_prefetch = 0 : i64, scratch_operands = 1 : i64, tpu.core_type = #tpu.core_type<tc>, window_params = [{transform_indices = @transform_0, window_bounds = array<i64: 1, 256>}, {transform_indices = @transform_1, window_bounds = array<i64: 256, 256>}, {transform_indices = @transform_2, window_bounds = array<i64: 4, 256>}]} {
    %c0_i32 = arith.constant 0 : i32
    %0 = arith.cmpi eq, %arg1, %c0_i32 : i32
    %1 = arith.extui %0 : i1 to i32
    %c0_i32_0 = arith.constant 0 : i32
    %2 = arith.cmpi ne, %1, %c0_i32_0 : i32
    scf.if %2 {
      %cst_10 = arith.constant 0.000000e+00 : f32
      %17 = vector.broadcast %cst_10 : f32 to vector<4x256xf32>
      %c0_11 = arith.constant 0 : index
      %c0_12 = arith.constant 0 : index
      %18 = vector.load %arg5[%c0_11, %c0_12] : memref<4x256xf32, #tpu.memory_space<vmem>>, vector<4x256xf32>
      tpu.vector_store %arg5[%c0_11, %c0_12], %17 {strides = array<i32>} : memref<4x256xf32, #tpu.memory_space<vmem>>, vector<4x256xf32>,
    } else {
    }
    %c0 = arith.constant 0 : index
    %c0_1 = arith.constant 0 : index
    %3 = vector.load %arg3[%c0, %c0_1] : memref<256x256xf32, #tpu.memory_space<vmem>>, vector<256x256xf32>
    %c0_2 = arith.constant 0 : index
    %c0_3 = arith.constant 0 : index
    %4 = vector.load %arg2[%c0_2, %c0_3] : memref<1x256xi32, #tpu.memory_space<vmem>>, vector<1x256xi32>
    %5 = tpu.iota {dimensions = array<i32: 0>} : vector<4x256xi32>
    %6 = vector.broadcast %4 : vector<1x256xi32> to vector<4x256xi32>
    %7 = arith.cmpi eq, %5, %6 : vector<4x256xi32>
    %8 = arith.extui %7 : vector<4x256xi1> to vector<4x256xi32>
    %9 = arith.sitofp %8 : vector<4x256xi32> to vector<4x256xf32>
    %c0_4 = arith.constant 0 : index
    %c0_5 = arith.constant 0 : index
    %10 = vector.load %arg5[%c0_4, %c0_5] : memref<4x256xf32, #tpu.memory_space<vmem>>, vector<4x256xf32>
    %cst = arith.constant dense<0.000000e+00> : vector<4x256xf32>
    %11 = tpu.matmul %9, %3, %cst {dimension_numbers = #tpu.dot_dimension_numbers<[1], [0], [0], [1], [0, 0, 1, 1], [], []>} : vector<4x256xf32>, vector<256x256xf32>, vector<4x256xf32> -> vector<4x256xf32>
    %12 = arith.addf %10, %11 : vector<4x256xf32>
    %c0_6 = arith.constant 0 : index
    %c0_7 = arith.constant 0 : index
    %13 = vector.load %arg5[%c0_6, %c0_7] : memref<4x256xf32, #tpu.memory_space<vmem>>, vector<4x256xf32>
    tpu.vector_store %arg5[%c0_6, %c0_7], %12 {strides = array<i32>} : memref<4x256xf32, #tpu.memory_space<vmem>>, vector<4x256xf32>,
    %c0_i32_8 = arith.constant 0 : i32
    %14 = arith.cmpi eq, %arg1, %c0_i32_8 : i32
    %15 = arith.extui %14 : i1 to i32
    %c0_i32_9 = arith.constant 0 : i32
    %16 = arith.cmpi ne, %15, %c0_i32_9 : i32
    scf.if %16 {
      %c0_10 = arith.constant 0 : index
      %c0_11 = arith.constant 0 : index
      %17 = vector.load %arg5[%c0_10, %c0_11] : memref<4x256xf32, #tpu.memory_space<vmem>>, vector<4x256xf32>
      %c0_12 = arith.constant 0 : index
      %c0_13 = arith.constant 0 : index
      %18 = vector.load %arg4[%c0_12, %c0_13] : memref<4x256xf32, #tpu.memory_space<vmem>>, vector<4x256xf32>
      tpu.vector_store %arg4[%c0_12, %c0_13], %17 {strides = array<i32>} : memref<4x256xf32, #tpu.memory_space<vmem>>, vector<4x256xf32>,
    } else {
    }
    return
  }
  func.func @transform_0(%arg0: i32, %arg1: i32) -> (i32, i32) {
    %c0_i32 = arith.constant 0 : i32
    %c0_i32_0 = arith.constant 0 : i32
    return %c0_i32, %arg1 : i32, i32
  }
  func.func @transform_1(%arg0: i32, %arg1: i32) -> (i32, i32) {
    %c0_i32 = arith.constant 0 : i32
    return %arg1, %arg0 : i32, i32
  }
  func.func @transform_2(%arg0: i32, %arg1: i32) -> (i32, i32) {
    %c0_i32 = arith.constant 0 : i32
    %c0_i32_0 = arith.constant 0 : i32
    return %c0_i32, %arg0 : i32, i32
  }
}

</mosaic_0001>

<bundles_post_ra>
// kernel: tpu_custom_call.1
= control target key start
LH: loop header
LB: loop body
LE: loop exit
PB: predicated region body
PF: predicated region fallthrough
CT: control target
= control target key end

     0   :  { %7 = vsyncpa [#allocation4], 0  ;;  %s341_s0 = inlined_call_operand.hbm [shape: s32[1,256], index: 0, kind: input, shape index: {}]   ;;  %s342_s1 = inlined_call_operand.hbm [shape: f32[256,256], index: 1, kind: input, shape index: {}]   ;;  %s343_s2 = inlined_call_operand.hbm [shape: f32[4,256], index: 2, kind: output, shape index: {}]  }
   0x1   :  { %8 = vsyncpa [#allocation7], 0 }
   0x2   :  { %9 = vsyncpa [#allocation5], 0  ;;  %s299_s9 = smov [#allocation3]   ;;  %s300_s11 = smov [#allocation6]  }
   0x3   :  { %s16_s10 = sshll.u32 %s299_s9, 4  ;;  %s25_s12 = sshll.u32 %s300_s11, 4  ;;  %s17_s10 = int_to_ptr.vmem [resolvable:$true] %s16_s10  ;;  %s26_s12 = int_to_ptr.vmem [resolvable:$true] %s25_s12 }
   0x4   :  { %s241_s13 = scalar_lea.vmem %s17_s10, 32  ;;  %p246_p1 = scmp.lt.s32.totalorder %s17_s10, %s17_s10 }
   0x5   :  { %p242_p0 = scmp.ne.s32.totalorder %s17_s10, %s241_s13  ;;  %p247_p2 = scmp.lt.s32.totalorder %s241_s13, %s241_s13 }
   0x7   :  { %p248_p3 = por %p247_p2, %p246_p1 }
   0x9   :  { %p249_p4 = pnand %p248_p3, %p242_p0 }
   0xb   :  { %252 = shalt.err (!%p249_p4)
}
   0xc   :  { %19 = dma.hbm_to_vmem [thread:$0]  %s341_s0, 32, %s17_s10, [#allocation4]  }
   0xd   :  { %s261_s16 = scalar_lea.vmem %s26_s12, 8192  ;;  %p266_p6 = scmp.lt.s32.totalorder %s26_s12, %s26_s12 }
   0xe   :  { %p262_p5 = scmp.ne.s32.totalorder %s26_s12, %s261_s16  ;;  %p267_p7 = scmp.lt.s32.totalorder %s261_s16, %s261_s16 }
  0x10   :  { %p268_p8 = por %p267_p7, %p266_p6 }
  0x12   :  { %p269_p9 = pnand %p268_p8, %p262_p5 }
  0x14   :  { %272 = shalt.err (!%p269_p9)
}
  0x15   :  { %s301_s17 = smov 256   ;;  %s302_s18 = smov 16  }
  0x16   :  { %31 = dma.hbm_to_vmem [thread:$0]  %s342_s1, 8192, %s26_s12, [#allocation7], %s301_s17, %s301_s17, %s302_s18  }
  0x17   :  { %293 = dma.done.wait [#allocation4], 32  }
  0x18   :  { %294 = vsyncadd [#allocation4], 4294967264 }
  0x19   :  { %295 = dma.done.wait [#allocation7], 8192  }
  0x1a   :  { %296 = vsyncadd [#allocation7], 4294959104  ;;  %v74_v0 = vld [vmem:[#allocation6 + $0xf8] sm:$0xff]  ;;  %v73_v1 = vld [vmem:[#allocation6 + $0xf0] sm:$0xff]  ;;  %v108_v13 = vlaneseq  ;;  %v303_v33 = vmov 1.0   ;;  %s304_s0 = smov [#allocation8]  }
  0x1b   :  { %v72_v2 = vld [vmem:[#allocation6 + $0xe8] sm:$0xff]  ;;  %125 = vmatprep.subr.mxu0 %v74_v0  ;;  %v71_v3 = vld [vmem:[#allocation6 + $0xe0] sm:$0xff]  ;;  %v70_v4 = vld [vmem:[#allocation6 + $0xd8] sm:$0xff]  ;;  %s213_s1 = sshll.u32 %s304_s0, 4  ;;  %s214_s1 = int_to_ptr.vmem [resolvable:$true] %s213_s1 }
  0x1c   :  { %126 = vmatpush1.msra.mxu0 %v73_v1  ;;  %v69_v5 = vld [vmem:[#allocation6 + $0xd0] sm:$0xff]  ;;  %v68_v6 = vld [vmem:[#allocation6 + $0xc8] sm:$0xff]  ;;  %v67_v7 = vld [vmem:[#allocation6 + $0xc0] sm:$0xff]  ;;  %v326_v18 = vshrl.u32 %v108_v13, 7  ;;  %s273_s21 = scalar_lea.vmem %s214_s1, 128  ;;  %p278_p11 = scmp.lt.s32.totalorder %s214_s1, %s214_s1 }
  0x1d   :  { %127 = vmatprep.subr.mxu0 %v72_v2  ;;  %v66_v8 = vld [vmem:[#allocation6 + $0xb8] sm:$0xff]  ;;  %v65_v9 = vld [vmem:[#allocation6 + $0xb0] sm:$0xff]  ;;  %v64_v10 = vld [vmem:[#allocation6 + $0xa8] sm:$0xff]  ;;  %p274_p10 = scmp.ne.s32.totalorder %s214_s1, %s273_s21  ;;  %p279_p12 = scmp.lt.s32.totalorder %s273_s21, %s273_s21 }
  0x1e   :  { %128 = vmatpush1.msra.mxu0 %v71_v3  ;;  %v63_v11 = vld [vmem:[#allocation6 + $0xa0] sm:$0xff]  ;;  %v62_v12 = vld [vmem:[#allocation6 + $0x98] sm:$0xff]  ;;  %v61_v14 = vld [vmem:[#allocation6 + $0x90] sm:$0xff]  ;;  %v116_v23 = vsub.s32 1, %v326_v18  ;;  %v112_v63 = vsub.s32 0, %v326_v18 }
  0x1f   :  { %129 = vmatprep.subr.mxu0 %v70_v4  ;;  %v60_v15 = vld [vmem:[#allocation6 + $0x88] sm:$0xff]  ;;  %v59_v16 = vld [vmem:[#allocation6 + $0x80] sm:$0xff]  ;;  %v58_v17 = vld [vmem:[#allocation6 + $0x78] sm:$0xff]  ;;  %p280_p13 = por %p279_p12, %p278_p11 }
  0x20   :  { %130 = vmatpush1.msra.mxu0 %v69_v5  ;;  %v57_v19 = vld [vmem:[#allocation6 + $0x70] sm:$0xff]  ;;  %v56_v20 = vld [vmem:[#allocation6 + $0x68] sm:$0xff]  ;;  %v55_v21 = vld [vmem:[#allocation6 + $0x60] sm:$0xff] }
  0x21   :  { %131 = vmatprep.subr.mxu0 %v68_v6  ;;  %v54_v22 = vld [vmem:[#allocation6 + $0x58] sm:$0xff]  ;;  %v53_v24 = vld [vmem:[#allocation6 + $0x50] sm:$0xff]  ;;  %v52_v25 = vld [vmem:[#allocation6 + $0x48] sm:$0xff]  ;;  %p281_p0 = pnand %p280_p13, %p274_p10 }
  0x22   :  { %132 = vmatpush1.msra.mxu0 %v67_v7  ;;  %v51_v26 = vld [vmem:[#allocation6 + $0x40] sm:$0xff]  ;;  %v329_v27 = vld [vmem:[#allocation3] sm:$0x3]  ;;  %v49_v30 = vld [vmem:[#allocation6 + $0x30] sm:$0xff] }
  0x23   :  { %133 = vmatprep.subr.mxu0 %v66_v8  ;;  %v50_v28 = vld [vmem:[#allocation6 + $0x38] sm:$0xff]  ;;  %v117_v29 = vrot.slane %v329_v27, %v116_v23  ;;  %v48_v31 = vld [vmem:[#allocation6 + $0x28] sm:$0xff]  ;;  %v47_v32 = vld [vmem:[#allocation6 + $0x20] sm:$0xff]  ;;  %v113_v4 = vrot.slane %v329_v27, %v112_v63 }
  0x24   :  { %134 = vmatpush1.msra.mxu0 %v65_v9  ;;  %v46_v34 = vld [vmem:[#allocation6 + $0x18] sm:$0xff]  ;;  %v45_v35 = vld [vmem:[#allocation6 + $0x10] sm:$0xff]  ;;  %v44_v36 = vld [vmem:[#allocation6 + $0x8] sm:$0xff] }
  0x25   :  { %135 = vmatprep.subr.mxu0 %v64_v10  ;;  %vm119_vm0 = vcmp.eq.s32.totalorder %v326_v18, %v117_v29  ;;  %v43_v37 = vld [vmem:[#allocation6] sm:$0xff]  ;;  %v106_v38 = vld [vmem:[#allocation6 + $0x1f8] sm:$0xff]  ;;  %v105_v39 = vld [vmem:[#allocation6 + $0x1f0] sm:$0xff]  ;;  %vm118_vm1 = vcmp.eq.s32.totalorder %v326_v18, %v113_v4 }
  0x26   :  { %136 = vmatpush1.msra.mxu0 %v63_v11  ;;  %225 = vmatprep.mubr.msk.f32.mxu0 %vm119_vm0, %v303_v33  ;;  %v104_v40 = vld [vmem:[#allocation6 + $0x1e8] sm:$0xff]  ;;  %v103_v41 = vld [vmem:[#allocation6 + $0x1e0] sm:$0xff]  ;;  %v102_v42 = vld [vmem:[#allocation6 + $0x1d8] sm:$0xff] }
  0x27   :  { %137 = vmatprep.subr.mxu0 %v62_v12  ;;  %v101_v43 = vld [vmem:[#allocation6 + $0x1d0] sm:$0xff]  ;;  %v100_v44 = vld [vmem:[#allocation6 + $0x1c8] sm:$0xff]  ;;  %v99_v45 = vld [vmem:[#allocation6 + $0x1c0] sm:$0xff] }
  0x28   :  { %138 = vmatpush1.msra.mxu0 %v61_v14  ;;  %v98_v46 = vld [vmem:[#allocation6 + $0x1b8] sm:$0xff]  ;;  %v97_v47 = vld [vmem:[#allocation6 + $0x1b0] sm:$0xff]  ;;  %v96_v48 = vld [vmem:[#allocation6 + $0x1a8] sm:$0xff] }
  0x29   :  { %139 = vmatprep.subr.mxu0 %v60_v15  ;;  %v95_v49 = vld [vmem:[#allocation6 + $0x1a0] sm:$0xff]  ;;  %v94_v50 = vld [vmem:[#allocation6 + $0x198] sm:$0xff]  ;;  %v93_v51 = vld [vmem:[#allocation6 + $0x190] sm:$0xff] }
  0x2a   :  { %140 = vmatpush1.msra.mxu0 %v59_v16  ;;  %v92_v52 = vld [vmem:[#allocation6 + $0x188] sm:$0xff]  ;;  %v91_v53 = vld [vmem:[#allocation6 + $0x180] sm:$0xff]  ;;  %v90_v54 = vld [vmem:[#allocation6 + $0x178] sm:$0xff] }
  0x2b   :  { %141 = vmatprep.subr.mxu0 %v58_v17  ;;  %v89_v55 = vld [vmem:[#allocation6 + $0x170] sm:$0xff]  ;;  %v88_v56 = vld [vmem:[#allocation6 + $0x168] sm:$0xff]  ;;  %v87_v57 = vld [vmem:[#allocation6 + $0x160] sm:$0xff] }
  0x2c   :  { %142 = vmatpush1.msra.mxu0 %v57_v19  ;;  %v86_v58 = vld [vmem:[#allocation6 + $0x158] sm:$0xff]  ;;  %v85_v59 = vld [vmem:[#allocation6 + $0x150] sm:$0xff]  ;;  %v84_v60 = vld [vmem:[#allocation6 + $0x148] sm:$0xff] }
  0x2d   :  { %143 = vmatprep.subr.mxu0 %v56_v20  ;;  %v83_v61 = vld [vmem:[#allocation6 + $0x140] sm:$0xff]  ;;  %v82_v62 = vld [vmem:[#allocation6 + $0x138] sm:$0xff]  ;;  %v81_v0 = vld [vmem:[#allocation6 + $0x130] sm:$0xff] }
  0x2e   :  { %144 = vmatpush1.msra.mxu0 %v55_v21  ;;  %v80_v1 = vld [vmem:[#allocation6 + $0x128] sm:$0xff]  ;;  %v79_v2 = vld [vmem:[#allocation6 + $0x120] sm:$0xff]  ;;  %v78_v3 = vld [vmem:[#allocation6 + $0x118] sm:$0xff] }
  0x2f   :  { %145 = vmatprep.subr.mxu0 %v54_v22  ;;  %v77_v5 = vld [vmem:[#allocation6 + $0x110] sm:$0xff]  ;;  %v76_v6 = vld [vmem:[#allocation6 + $0x108] sm:$0xff]  ;;  %v75_v7 = vld [vmem:[#allocation6 + $0x100] sm:$0xff] }
  0x30   :  { %146 = vmatpush1.msra.mxu0 %v53_v24 }
  0x31   :  { %147 = vmatprep.subr.mxu0 %v52_v25 }
  0x32   :  { %148 = vmatpush1.msra.mxu0 %v51_v26 }
  0x33   :  { %149 = vmatprep.subr.mxu0 %v50_v28 }
  0x34   :  { %150 = vmatpush1.msra.mxu0 %v49_v30 }
  0x35   :  { %151 = vmatprep.subr.mxu0 %v48_v31 }
  0x36   :  { %152 = vmatpush1.msra.mxu0 %v47_v32 }
  0x37   :  { %153 = vmatprep.subr.mxu0 %v46_v34 }
  0x38   :  { %154 = vmatpush1.msra.mxu0 %v45_v35 }
  0x39   :  { %155 = vmatprep.subr.mxu0 %v44_v36 }
  0x3a   :  { %156 = vmatpush1.msra.mxu0 %v43_v37 }
  0x3b   :  { %157 = vmatprep.subr.mxu0 %v106_v38 }
  0x3c   :  { %158 = vmatpush2.msra.mxu0 %v105_v39 }
  0x3d   :  { %159 = vmatprep.subr.mxu0 %v104_v40 }
  0x3e   :  { %160 = vmatpush2.msra.mxu0 %v103_v41 }
  0x3f   :  { %161 = vmatprep.subr.mxu0 %v102_v42 }
  0x40   :  { %162 = vmatpush2.msra.mxu0 %v101_v43 }
  0x41   :  { %163 = vmatprep.subr.mxu0 %v100_v44 }
  0x42   :  { %164 = vmatpush2.msra.mxu0 %v99_v45 }
  0x43   :  { %165 = vmatprep.subr.mxu0 %v98_v46 }
  0x44   :  { %166 = vmatpush2.msra.mxu0 %v97_v47 }
  0x45   :  { %167 = vmatprep.subr.mxu0 %v96_v48 }
  0x46   :  { %168 = vmatpush2.msra.mxu0 %v95_v49 }
  0x47   :  { %169 = vmatprep.subr.mxu0 %v94_v50 }
  0x48   :  { %170 = vmatpush2.msra.mxu0 %v93_v51 }
  0x49   :  { %171 = vmatprep.subr.mxu0 %v92_v52 }
  0x4a   :  { %172 = vmatpush2.msra.mxu0 %v91_v53 }
  0x4b   :  { %173 = vmatprep.subr.mxu0 %v90_v54 }
  0x4c   :  { %174 = vmatpush2.msra.mxu0 %v89_v55 }
  0x4d   :  { %175 = vmatprep.subr.mxu0 %v88_v56 }
  0x4e   :  { %176 = vmatpush2.msra.mxu0 %v87_v57 }
  0x4f   :  { %177 = vmatprep.subr.mxu0 %v86_v58 }
  0x50   :  { %178 = vmatpush2.msra.mxu0 %v85_v59 }
  0x51   :  { %179 = vmatprep.subr.mxu0 %v84_v60 }
  0x52   :  { %180 = vmatpush2.msra.mxu0 %v83_v61 }
  0x53   :  { %181 = vmatprep.subr.mxu0 %v82_v62 }
  0x54   :  { %182 = vmatpush2.msra.mxu0 %v81_v0 }
  0x55   :  { %183 = vmatprep.subr.mxu0 %v80_v1 }
  0x56   :  { %184 = vmatpush2.msra.mxu0 %v79_v2 }
  0x57   :  { %185 = vmatprep.subr.mxu0 %v78_v3 }
  0x58   :  { %186 = vmatpush2.msra.mxu0 %v77_v5 }
  0x59   :  { %187 = vmatprep.subr.mxu0 %v76_v6 }
  0x5a   :  { %188 = vmatpush2.msra.mxu0 %v75_v7 }
  0x5b   :  { %226 = vmatmul.mubr.msk.f32.vlgmr.msra.gmra.mxu0 %vm118_vm1, %v303_v33 }
 0x11b   :  { %v191_v8 = vpop.f32.mrf.mxu0 }
 0x11d   :  { %v193_v9 = vpop.f32.mrf.mxu0 }
 0x11e   :  { %v198_v10 = vcombine.low %v191_v8, %v193_v9 }
 0x120   :  { %206 = vst [vmem:[#allocation8] sm:$0xff] %v198_v10 }
 0x121   :  { %284 = shalt.err (!%p281_p0)
}
 0x122   :  { %216 = dma.vmem_to_hbm [thread:$0]  %s214_s1, 128, %s343_s2, [#allocation5]  }
 0x123   :  { %297 = dma.done.wait [#allocation5], 128  }
 0x124   :  { %298 = vsyncadd [#allocation5], 4294967168 }
 0x125   :  { %220 = vsyncpa [#allocation4], 1 }
 0x126   :  { %221 = vsyncpa [#allocation7], 1 }
 0x127   :  { %222 = vsyncpa [#allocation5], 1 }

</bundles_post_ra>
